<compile_context>
chip_gen: v6e
topology: v6e:2x2x1
jax: 0.10.0
libtpu: 0.0.40
codegen_flags: <defaults>
</compile_context>

<pallas_src>
import jax
import jax.numpy as jnp
from jax.experimental import pallas as pl
from jax.experimental.pallas import tpu as pltpu

LANES = 128      # lane width
MAX_TM = 1024    # max sublane rows per tile: 1024*128*4 B = 512 KiB / input / buffer
NCORES = 2       # leading "parallel" grid axis (v7x megacore; no-op elsewhere)


def _round_up(x, m):
    return ((x + m - 1) // m) * m


def _iou_kernel(x_ref, t_ref, inter_ref, total_ref):
    # grid = (NCORES, steps); axis 1 is the streaming / reduction axis.
    i = pl.program_id(1)

    @pl.when(i == 0)
    def _():
        inter_ref[...] = jnp.zeros_like(inter_ref)
        total_ref[...] = jnp.zeros_like(total_ref)

    x = x_ref[...].astype(jnp.float32)
    t = t_ref[...].astype(jnp.float32)
    s = jax.nn.sigmoid(x)

    tm = x_ref.shape[0]
    # VPU-only partial sums into the resident (8, 128) output accumulators.
    inter_ref[...] += jnp.sum((s * t).reshape(tm // 8, 8, LANES), axis=0)
    total_ref[...] += jnp.sum((s + t).reshape(tm // 8, 8, LANES), axis=0)


def iou_loss_pallas(inputs, targets, smooth=1.0):
    x = jnp.ravel(inputs).astype(jnp.float32)
    t = jnp.ravel(targets).astype(jnp.float32)
    n = x.shape[0]

    # Adaptive row tile: multiple of 8 sublanes, capped at MAX_TM, split 2 ways.
    rows_needed = pl.cdiv(n, LANES)
    tm = min(MAX_TM, _round_up(pl.cdiv(rows_needed, NCORES), 8))
    chunk_rows = NCORES * tm
    rows = _round_up(rows_needed, chunk_rows)
    n_pad = rows * LANES
    pad = n_pad - n

    # TODO(synk): when n is not a multiple of NCORES*tm*128 this jnp.pad makes
    # one extra HBM copy of each stream; a fully copy-free variant would mask
    # the ragged last tile in-kernel via a scalar-prefetched element count.
    if pad:
        x = jnp.pad(x, (0, pad))
        t = jnp.pad(t, (0, pad))

    x2 = x.reshape(rows, LANES)
    t2 = t.reshape(rows, LANES)

    steps = rows // chunk_rows

    inter_out, total_out = pl.pallas_call(
        _iou_kernel,
        out_shape=(
            jax.ShapeDtypeStruct((NCORES * 8, LANES), jnp.float32),
            jax.ShapeDtypeStruct((NCORES * 8, LANES), jnp.float32),
        ),
        grid_spec=pltpu.PrefetchScalarGridSpec(
            num_scalar_prefetch=0,
            grid=(NCORES, steps),
            in_specs=[
                pl.BlockSpec((tm, LANES), lambda c, i: (c * steps + i, 0)),
                pl.BlockSpec((tm, LANES), lambda c, i: (c * steps + i, 0)),
            ],
            out_specs=[
                pl.BlockSpec((8, LANES), lambda c, i: (c, 0)),
                pl.BlockSpec((8, LANES), lambda c, i: (c, 0)),
            ],
        ),
        compiler_params=pltpu.CompilerParams(
            dimension_semantics=("parallel", "arbitrary"),
        ),
    )(x2, t2)

    inter = jnp.sum(inter_out)
    # Padded logits are 0 -> sigmoid(0)=0.5; padded targets are 0. Only `total`
    # needs the statically-known correction; `inter` is already exact.
    total = jnp.sum(total_out) - 0.5 * pad
    union = total - inter
    return 1.0 - (inter + smooth) / (union + smooth)


def iou_loss_ref(inputs, targets, smooth=1.0):
    x = jax.nn.sigmoid(inputs.astype(jnp.float32)).ravel()
    t = targets.astype(jnp.float32).ravel()
    inter = jnp.sum(x * t)
    total = jnp.sum(x + t)
    union = total - inter
    return 1.0 - (inter + smooth) / (union + smooth)


if __name__ == "__main__":
    key = jax.random.PRNGKey(0)
    k1, k2 = jax.random.split(key)

    B, C, H, W = 2, 4, 16, 16
    logits = jax.random.normal(k1, (B, C, H, W), dtype=jnp.float32)
    targets = (jax.random.uniform(k2, (B, C, H, W)) > 0.5).astype(jnp.float32)

    loss = iou_loss_pallas(logits, targets)
    loss = jax.block_until_ready(loss)

    ref = iou_loss_ref(logits, targets)
    assert jnp.allclose(loss, ref, atol=1e-5, rtol=1e-5), (loss, ref)

    print("KERNEL_OK")
</pallas_src>

<mosaic_0001>
module attributes {stable_mosaic.version = 11 : i64} {
  func.func @_iou_kernel(%arg0: i32, %arg1: i32, %arg2: memref<8x128xf32, #tpu.memory_space<vmem>>, %arg3: memref<8x128xf32, #tpu.memory_space<vmem>>, %arg4: memref<8x128xf32, #tpu.memory_space<vmem>>, %arg5: memref<8x128xf32, #tpu.memory_space<vmem>>) attributes {dimension_semantics = [#tpu.dimension_semantics<parallel>, #tpu.dimension_semantics<arbitrary>], iteration_bounds = array<i64: 2, 1>, scalar_prefetch = 0 : i64, scratch_operands = 0 : i64, tpu.core_type = #tpu.core_type<tc>, window_params = [{transform_indices = @transform_0, window_bounds = array<i64: 8, 128>}, {transform_indices = @transform_1, window_bounds = array<i64: 8, 128>}, {transform_indices = @transform_2, window_bounds = array<i64: 8, 128>}, {transform_indices = @transform_3, window_bounds = array<i64: 8, 128>}]} {
    %c0_i32 = arith.constant 0 : i32
    %0 = arith.cmpi eq, %arg1, %c0_i32 : i32
    %1 = arith.extui %0 : i1 to i32
    %c0_i32_0 = arith.constant 0 : i32
    %2 = arith.cmpi ne, %1, %c0_i32_0 : i32
    scf.if %2 {
      %cst_14 = arith.constant 0.000000e+00 : f32
      %22 = vector.broadcast %cst_14 : f32 to vector<8x128xf32>
      %c0_15 = arith.constant 0 : index
      %c0_16 = arith.constant 0 : index
      %23 = vector.load %arg4[%c0_15, %c0_16] : memref<8x128xf32, #tpu.memory_space<vmem>>, vector<8x128xf32>
      tpu.vector_store %arg4[%c0_15, %c0_16], %22 {strides = array<i32>} : memref<8x128xf32, #tpu.memory_space<vmem>>, vector<8x128xf32>,
      %cst_17 = arith.constant 0.000000e+00 : f32
      %24 = vector.broadcast %cst_17 : f32 to vector<8x128xf32>
      %c0_18 = arith.constant 0 : index
      %c0_19 = arith.constant 0 : index
      %25 = vector.load %arg5[%c0_18, %c0_19] : memref<8x128xf32, #tpu.memory_space<vmem>>, vector<8x128xf32>
      tpu.vector_store %arg5[%c0_18, %c0_19], %24 {strides = array<i32>} : memref<8x128xf32, #tpu.memory_space<vmem>>, vector<8x128xf32>,
    } else {
    }
    %c0 = arith.constant 0 : index
    %c0_1 = arith.constant 0 : index
    %3 = vector.load %arg2[%c0, %c0_1] : memref<8x128xf32, #tpu.memory_space<vmem>>, vector<8x128xf32>
    %c0_2 = arith.constant 0 : index
    %c0_3 = arith.constant 0 : index
    %4 = vector.load %arg3[%c0_2, %c0_3] : memref<8x128xf32, #tpu.memory_space<vmem>>, vector<8x128xf32>
    %5 = arith.negf %3 : vector<8x128xf32>
    %6 = math.exp %5 : vector<8x128xf32>
    %cst = arith.constant 1.000000e+00 : f32
    %7 = vector.broadcast %cst : f32 to vector<8x128xf32>
    %8 = arith.addf %7, %6 : vector<8x128xf32>
    %9 = arith.divf %7, %8 : vector<8x128xf32>
    %c0_4 = arith.constant 0 : index
    %c0_5 = arith.constant 0 : index
    %10 = vector.load %arg4[%c0_4, %c0_5] : memref<8x128xf32, #tpu.memory_space<vmem>>, vector<8x128xf32>
    %11 = arith.mulf %9, %4 : vector<8x128xf32>
    %12 = vector.shape_cast %11 : vector<8x128xf32> to vector<1x8x128xf32>
    %cst_6 = arith.constant dense<0.000000e+00> : vector<8x128xf32>
    %13 = vector.multi_reduction <add>, %12, %cst_6 [0] : vector<1x8x128xf32> to vector<8x128xf32>
    %14 = arith.addf %10, %13 : vector<8x128xf32>
    %c0_7 = arith.constant 0 : index
    %c0_8 = arith.constant 0 : index
    %15 = vector.load %arg4[%c0_7, %c0_8] : memref<8x128xf32, #tpu.memory_space<vmem>>, vector<8x128xf32>
    tpu.vector_store %arg4[%c0_7, %c0_8], %14 {strides = array<i32>} : memref<8x128xf32, #tpu.memory_space<vmem>>, vector<8x128xf32>,
    %c0_9 = arith.constant 0 : index
    %c0_10 = arith.constant 0 : index
    %16 = vector.load %arg5[%c0_9, %c0_10] : memref<8x128xf32, #tpu.memory_space<vmem>>, vector<8x128xf32>
    %17 = arith.addf %9, %4 : vector<8x128xf32>
    %18 = vector.shape_cast %17 : vector<8x128xf32> to vector<1x8x128xf32>
    %cst_11 = arith.constant dense<0.000000e+00> : vector<8x128xf32>
    %19 = vector.multi_reduction <add>, %18, %cst_11 [0] : vector<1x8x128xf32> to vector<8x128xf32>
    %20 = arith.addf %16, %19 : vector<8x128xf32>
    %c0_12 = arith.constant 0 : index
    %c0_13 = arith.constant 0 : index
    %21 = vector.load %arg5[%c0_12, %c0_13] : memref<8x128xf32, #tpu.memory_space<vmem>>, vector<8x128xf32>
    tpu.vector_store %arg5[%c0_12, %c0_13], %20 {strides = array<i32>} : memref<8x128xf32, #tpu.memory_space<vmem>>, vector<8x128xf32>,
    return
  }
  func.func @transform_0(%arg0: i32, %arg1: i32) -> (i32, i32) {
    %c1_i32 = arith.constant 1 : i32
    %0 = arith.muli %arg0, %c1_i32 : i32
    %1 = arith.addi %0, %arg1 : i32
    %c0_i32 = arith.constant 0 : i32
    %c0_i32_0 = arith.constant 0 : i32
    return %1, %c0_i32 : i32, i32
  }
  func.func @transform_1(%arg0: i32, %arg1: i32) -> (i32, i32) {
    %c1_i32 = arith.constant 1 : i32
    %0 = arith.muli %arg0, %c1_i32 : i32
    %1 = arith.addi %0, %arg1 : i32
    %c0_i32 = arith.constant 0 : i32
    %c0_i32_0 = arith.constant 0 : i32
    return %1, %c0_i32 : i32, i32
  }
  func.func @transform_2(%arg0: i32, %arg1: i32) -> (i32, i32) {
    %c0_i32 = arith.constant 0 : i32
    %c0_i32_0 = arith.constant 0 : i32
    return %arg0, %c0_i32 : i32, i32
  }
  func.func @transform_3(%arg0: i32, %arg1: i32) -> (i32, i32) {
    %c0_i32 = arith.constant 0 : i32
    %c0_i32_0 = arith.constant 0 : i32
    return %arg0, %c0_i32 : i32, i32
  }
}

</mosaic_0001>

<bundles_post_ra>
// kernel: tpu_custom_call.1
= control target key start
LH: loop header
LB: loop body
LE: loop exit
PB: predicated region body
PF: predicated region fallthrough
CT: control target
= control target key end

     0   :  { %9 = vsyncpa [#allocation3], 0  ;;  %s945_s0 = inlined_call_operand.hbm [shape: f32[16,128], index: 0, kind: input, shape index: {}]   ;;  %s946_s1 = inlined_call_operand.hbm [shape: f32[16,128], index: 1, kind: input, shape index: {}]   ;;  %s947_s2 = inlined_call_operand.hbm [shape: f32[16,128], index: 2, kind: output, shape index: {0}]   ;;  %s948_s3 = inlined_call_operand.hbm [shape: f32[16,128], index: 3, kind: output, shape index: {1}]  }
   0x1   :  { %11 = vsyncpa [#allocation3 + $0x1], 0 }
   0x2   :  { %12 = vsyncpa [#allocation6], 0 }
   0x3   :  { %14 = vsyncpa [#allocation6 + $0x1], 0 }
   0x4   :  { %15 = vsyncpa [#allocation4], 0 }
   0x5   :  { %17 = vsyncpa [#allocation4 + $0x1], 0 }
   0x6   :  { %18 = vsyncpa [#allocation9], 0 }
   0x7   :  { %20 = vsyncpa [#allocation9 + $0x1], 0  ;;  %s738_s12 = smov 0   ;;  %s740_s13 = smov 0  }
   0x8   :  { %s742_s14 = smov 0   ;;  %s744_s15 = smov 0  }
   0x9   :  { %s746_s16 = smov 0   ;;  %s748_s17 = smov 0  }
   0xa LB: > { %s445_s18 = sadd.s32 4294967295, %s712_s17   ;;  %s446_s19 = sadd.s32 4294967294, %s712_s17   ;;  %s712_s17 = sphi %s748_s17, %s26_s17   ;;  %s708_s16 = sphi %s746_s16, %s960_s16   ;;  %s704_s15 = sphi %s744_s15, %s959_s15   ;;  %s700_s14 = sphi %s742_s14, %s958_s14   ;;  %s696_s13 = sphi %s740_s13, %s957_s13   ;;  %s692_s12 = sphi %s738_s12, %s956_s12  }
   0xb   : > { %s38_s20 = sadd.s32 1, %s708_s16  ;;  %s47_s21 = sadd.s32 1, %s700_s14 }
   0xc   : > { %p40_p0 = scmp.ge.s32.totalorder %s38_s20, 2  ;;  %p54_p1 = scmp.ne.s32.totalorder %s700_s14, %s696_s13 }
   0xd   : > { %p55_p2 = scmp.eq.s32.totalorder %s712_s17, 0  ;;  %p60_p3 = scmp.ne.s32.totalorder %s696_s13, %s692_s12 }
   0xe   : > { %s962_s20 = smov (%p40_p0, %s38_s20), 0  ;;  %p61_p5 = scmp.eq.s32.totalorder %s445_s18, 0 }
   0xf   : > { %p779_p4 = por %p55_p2, %p54_p1  ;;  %s44_s23 = ssub.s32 %s708_s16, %s962_s20 }
  0x10   : > { %p112_p6 = scmp.eq.s32.totalorder %s445_s18, 1  ;;  %p45_p7 = scmp.eq.s32.totalorder %s44_s23, 0 }
  0x11   : > { %p785_p8 = por %p61_p5, %p60_p3  ;;  %p118_p10 = scmp.eq.s32.totalorder %s446_s19, 1 }
  0x12   : > { %p789_p9 = por %p112_p6, %p54_p1  ;;  %p487_p13 = scmp.lt.s32.totalorder %s712_s17, 2 }
  0x13   : > { %s794_s26 = scalar_select %p45_p7, %s700_s14, %s47_s21  }
  0x14   : > { %p796_p11 = por %p118_p10, %p60_p3  ;;  %s803_s28 = sand.u32 1, %s700_s14  }
  0x15   : > { %s449_s29 = sshll.u32 %s803_s28, 3  ;;  %s450_s30 = sshll.u32 %s708_s16, 7 }
  0x16   : > { %s174_s6 = scalar_lea.hbm %s945_s0, %s450_s30  ;;  %s168_s7 = scalar_lea.vmem [#allocation2], %s449_s29 }
  0x17   : > { %s176_s8 = sshll.u32 %s168_s7, 4  ;;  %p812_p0 = pnand %p487_p13, %p779_p4  ;;  %s177_s8 = int_to_ptr.vmem [resolvable:$true] %s176_s8 }
  0x18   : > { %p453_p1 = scmp.ge.s32.totalorder %s712_s17, 1  ;;  %p200_p2 = scmp.lt.s32.totalorder %s712_s17, 3 }
  0x19   : > { %s165_s10 = scalar_lea.sflag [#allocation3], %s803_s28  ;;  %p544_p3 = pneg %p812_p0 }
  0x1a   : > { %s555_s11 = scalar_lea.vmem %s177_s8, 128  ;;  %s714_s18 = smov [#allocation2]  }
  0x1b   : > { %p556_p5 = scmp.ne.s32.totalorder %s177_s8, %s555_s11  ;;  %s560_s19 = sshll.u32 %s714_s18, 4  ;;  %s561_s19 = int_to_ptr.vmem [resolvable:$false] %s560_s19 }
  0x1c   : > { %s562_s21 = scalar_lea.vmem %s561_s19, 256  ;;  %p563_p4 = scmp.lt.s32.totalorder %s177_s8, %s561_s19 }
  0x1d   : > { %p558_p6 = pnand %p556_p5, %p544_p3  ;;  %p564_p10 = scmp.lt.s32.totalorder %s562_s21, %s555_s11 }
  0x1f   : > { %p559_p7 = pneg %p558_p6  ;;  %p565_p13 = por %p564_p10, %p563_p4 }
  0x21   : > { %p566_p12 = pnand %p565_p13, %p559_p7 }
  0x23   : > { %569 = shalt.err (!%p566_p12)
}
  0x24   : > { %476 = dma.hbm_to_vmem [thread:$0]  (!%p812_p0), %s174_s6, 128, %s177_s8, %s165_s10  }
  0x25   : > { %p830_p5 = pnand %p453_p1, %p200_p2  ;;  %s193_s5 = scalar_lea.hbm %s946_s1, %s450_s30 }
  0x26   : > { %s187_s7 = scalar_lea.vmem [#allocation5], %s449_s29  ;;  %s184_s18 = scalar_lea.sflag [#allocation6], %s803_s28 }
  0x27   : > { %s195_s11 = sshll.u32 %s187_s7, 4  ;;  %s715_s6 = smov [#allocation5]   ;;  %s196_s11 = int_to_ptr.vmem [resolvable:$true] %s195_s11 }
  0x28   : > { %s583_s19 = scalar_lea.vmem %s196_s11, 128  ;;  %s588_s8 = sshll.u32 %s715_s6, 4  ;;  %s589_s8 = int_to_ptr.vmem [resolvable:$false] %s588_s8 }
  0x29   : > { %p584_p12 = scmp.ne.s32.totalorder %s196_s11, %s583_s19  ;;  %s590_s10 = scalar_lea.vmem %s589_s8, 256 }
  0x2a   : > { %p591_p1 = scmp.lt.s32.totalorder %s196_s11, %s589_s8  ;;  %p592_p2 = scmp.lt.s32.totalorder %s590_s10, %s583_s19 }
  0x2b   : > { %p586_p6 = pnand %p584_p12, %p544_p3 }
  0x2c   : > { %p593_p4 = por %p592_p2, %p591_p1 }
  0x2d   : > { %p587_p7 = pneg %p586_p6 }
  0x2f   : > { %p594_p10 = pnand %p593_p4, %p587_p7 }
  0x31   : > { %597 = shalt.err (!%p594_p10)
}
  0x32   : > { %479 = dma.hbm_to_vmem [thread:$0]  (!%p812_p0), %s193_s5, 128, %s196_s11, %s184_s18  }
  0x33   : > { %204 = sbr.rel (%p830_p5) target bundleno = 129 (0x81), region = 28  ;;  %s846_s28 = sand.u32 (!%p830_p5), 1, %s696_s13  }
  0x34   : > { %s849_s29 = sshll.u32 (!%p830_p5), %s846_s28, 3  ;;  %s207_s30 = scalar_lea.sflag (!%p830_p5), [#allocation3], %s846_s28 }
  0x35   : > { %s210_s21 = scalar_lea.vmem (!%p830_p5), [#allocation2], %s849_s29 }
  0x38   : > { %675 = dma.done.wait (%p785_p8), %s207_s30, 128  }
  0x39   : > { %677 = vsyncadd (%p785_p8), %s207_s30, 4294967168  ;;  %s216_s9 = scalar_lea.sflag [#allocation6], %s846_s28  ;;  %s219_s22 = scalar_lea.vmem [#allocation5], %s849_s29 }
  0x3a   : > { %679 = dma.done.wait (%p785_p8), %s216_s9, 128  }
  0x3b   : > { %681 = vsyncadd (%p785_p8), %s216_s9, 4294967168  ;;  %v260_v0 = vld [vmem:[%s210_s21] sm:$0xff]  ;;  %v261_v4 = vld [vmem:[%s219_s22] sm:$0xff]  ;;  %s461_s23 = sshll.u32 %s704_s15, 7  ;;  %s244_s4 = scalar_lea.vmem [#allocation7], %s849_s29 }
  0x3c   : > { %v458_v1 = vmul.f32 -1.442695, %v260_v0  ;;  %s297_s5 = sshll.u32 %s244_s4, 4  ;;  %s251_s24 = scalar_lea.vmem [#allocation8], %s849_s29  ;;  %s871_s5 = int_to_ptr.vmem [resolvable:$true] %s297_s5 }
  0x3d   : > { %s310_s7 = sshll.u32 %s251_s24, 4  ;;  %s869_s19 = scalar_lea.hbm %s947_s2, %s461_s23  ;;  %s878_s7 = int_to_ptr.vmem [resolvable:$true] %s310_s7 }
  0x3e   : > { %538 = vpow2.f32 %v458_v1  ;;  %s876_s15 = scalar_lea.hbm %s948_s3, %s461_s23  ;;  %s279_s10 = scalar_lea.sflag [#allocation4], %s846_s28 }
  0x3f   : > { %s598_s29 = scalar_lea.vmem %s871_s5, 128  ;;  %s716_s30 = smov [#allocation7]  }
  0x40   : > { %p599_p8 = scmp.ne.s32.totalorder %s871_s5, %s598_s29  ;;  %s602_s21 = sshll.u32 %s716_s30, 4  ;;  %s603_s21 = int_to_ptr.vmem [resolvable:$false] %s602_s21 }
  0x41   : > { %s604_s9 = scalar_lea.vmem %s603_s21, 256  ;;  %p605_p13 = scmp.lt.s32.totalorder %s871_s5, %s603_s21 }
  0x42   : > { %p600_p0 = pnand %p599_p8, %p789_p9  ;;  %p606_p5 = scmp.lt.s32.totalorder %s604_s9, %s598_s29 }
  0x44   : > { %p601_p3 = pneg %p600_p0  ;;  %p607_p12 = por %p606_p5, %p605_p13 }
  0x46   : > { %p608_p6 = pnand %p607_p12, %p601_p3 }
  0x4b   : > { %v539_v2 = vpop.eup %538 }
  0x4c   : > { %v265_v3 = vadd.f32 1.0, %v539_v2 }
  0x4e   : > { %540 = vrcp.f32 %v265_v3 }
  0x5b   : > { %v541_v5 = vpop.eup %540 }
  0x5c   : > { %v269_v6 = vmul.f32 %v541_v5, %v261_v4  ;;  %v274_v7 = vadd.f32 %v541_v5, %v261_v4 }
  0x5e   : > { %272 = vst [vmem:[%s244_s4] sm:$0xff] %v269_v6  ;;  %277 = vst [vmem:[%s251_s24] sm:$0xff] %v274_v7 }
  0x5f   : > { %611 = shalt.err (!%p608_p6)
}
  0x60   : > { %s612_s22 = scalar_lea.hbm %s869_s19, 128  ;;  %s616_s24 = scalar_lea.hbm %s947_s2, 256 }
  0x61   : > { %p613_p7 = scmp.ne.s32.totalorder %s869_s19, %s612_s22  ;;  %p617_p4 = scmp.lt.s32.totalorder %s869_s19, %s947_s2 }
  0x62   : > { %p618_p10 = scmp.lt.s32.totalorder %s616_s24, %s612_s22 }
  0x63   : > { %p614_p1 = pnand %p613_p7, %p789_p9 }
  0x64   : > { %p619_p8 = por %p618_p10, %p617_p4 }
  0x65   : > { %p615_p2 = pneg %p614_p1 }
  0x67   : > { %p620_p0 = pnand %p619_p8, %p615_p2 }
  0x69   : > { %623 = shalt.err (!%p620_p0)
}
  0x6a   : > { %469 = dma.vmem_to_hbm [thread:$0]  (%p789_p9), %s871_s5, 128, %s869_s19, %s279_s10  }
  0x6b   : > { %s284_s6 = scalar_lea.sflag [#allocation9], %s846_s28  ;;  %s624_s8 = scalar_lea.vmem %s878_s7, 128 }
  0x6c   : > { %p625_p3 = scmp.ne.s32.totalorder %s878_s7, %s624_s8  ;;  %s717_s29 = smov [#allocation8]  }
  0x6d   : > { %s628_s30 = sshll.u32 %s717_s29, 4  ;;  %s629_s30 = int_to_ptr.vmem [resolvable:$false] %s628_s30 }
  0x6e   : > { %p626_p13 = pnand %p625_p3, %p789_p9  ;;  %s630_s21 = scalar_lea.vmem %s629_s30, 256 }
  0x6f   : > { %p631_p12 = scmp.lt.s32.totalorder %s878_s7, %s629_s30  ;;  %p632_p6 = scmp.lt.s32.totalorder %s630_s21, %s624_s8 }
  0x70   : > { %p627_p5 = pneg %p626_p13 }
  0x71   : > { %p633_p7 = por %p632_p6, %p631_p12 }
  0x73   : > { %p634_p1 = pnand %p633_p7, %p627_p5 }
  0x75   : > { %637 = shalt.err (!%p634_p1)
}
  0x76   : > { %s638_s5 = scalar_lea.hbm %s876_s15, 128  ;;  %s642_s10 = scalar_lea.hbm %s948_s3, 256 }
  0x77   : > { %p639_p2 = scmp.ne.s32.totalorder %s876_s15, %s638_s5  ;;  %p643_p8 = scmp.lt.s32.totalorder %s876_s15, %s948_s3 }
  0x78   : > { %p644_p0 = scmp.lt.s32.totalorder %s642_s10, %s638_s5 }
  0x79   : > { %p640_p4 = pnand %p639_p2, %p789_p9 }
  0x7a   : > { %p645_p3 = por %p644_p0, %p643_p8 }
  0x7b   : > { %p641_p10 = pneg %p640_p4 }
  0x7d   : > { %p646_p13 = pnand %p645_p3, %p641_p10 }
  0x7f   : > { %649 = shalt.err (!%p646_p13)
}
  0x80   : > { %470 = dma.vmem_to_hbm [thread:$0]  (%p789_p9), %s878_s7, 128, %s876_s15, %s284_s6  }
  0x81 PF: > { %s322_s23 = sand.u32 1, %s692_s12   ;;  %p955_p5 = scmp.ge.s32.totalorder %s712_s17, 2 }
  0x82   : > { %s323_s4 = scalar_lea.sflag [#allocation4], %s322_s23 }
  0x83   : > { %p481_p12 = pnand %p955_p5, %p796_p11 }
  0x85   : > { %p482_p6 = pneg %p481_p12 }
  0x87   : > { %683 = dma.done.wait (%p482_p6), %s323_s4, 128  }
  0x88   : > { %685 = vsyncadd (%p482_p6), %s323_s4, 4294967168  ;;  %s332_s24 = scalar_lea.sflag [#allocation9], %s322_s23 }
  0x89   : > { %687 = dma.done.wait (%p482_p6), %s332_s24, 128  }
  0x8a   : > { %689 = vsyncadd (%p482_p6), %s332_s24, 4294967168  ;;  %s26_s17 = sadd.s32 1, %s712_s17   ;;  %s956_s12 = smov %s696_s13 }
  0x8b   : > { %p23_p7 = scmp.ge.s32.totalorder %s26_s17, 4   ;;  %s957_s13 = smov %s700_s14 }
  0x8c   : > { %s958_s14 = smov %s794_s26  ;;  %s959_s15 = smov %s708_s16 }
  0x8d   : > { %s960_s16 = smov %s962_s20  ;;  %25 = sbr.rel (!%p23_p7) target bundleno = 10 (0xa), region = 107 }
  0x92   :  { %337 = vsyncpa [#allocation3], 1 }
  0x93   :  { %339 = vsyncpa [#allocation3 + $0x1], 1 }
  0x94   :  { %340 = vsyncpa [#allocation6], 1 }
  0x95   :  { %342 = vsyncpa [#allocation6 + $0x1], 1 }
  0x96   :  { %343 = vsyncpa [#allocation4], 1 }
  0x97   :  { %345 = vsyncpa [#allocation4 + $0x1], 1 }
  0x98   :  { %346 = vsyncpa [#allocation9], 1 }
  0x99   :  { %348 = vsyncpa [#allocation9 + $0x1], 1 }

</bundles_post_ra>
